<compile_context>
chip_gen: v7x
topology: tpu7x:2x2x1
jax: 0.10.0
libtpu: 0.0.40
codegen_flags: <defaults>
</compile_context>

<pallas_src>
import jax
import jax.numpy as jnp
from jax.experimental import pallas as pl
from jax.experimental.pallas import tpu as pltpu


_TILE_TARGET_BYTES = 4 * 1024 * 1024      # ~4 MiB per tile
_VMEM_LIMIT_BYTES = 32 * 1024 * 1024      # explicit scoped-VMEM budget (safe on v5e/v6e/v7x)


def _copy_kernel(x_ref, o_ref):
    # Identity forward: whole-tile load + store.
    o_ref[...] = x_ref[...]


def _sublane_multiple(itemsize: int) -> int:
    # Packed sublane count: 8 for 4-byte dtypes, 16 for 2-byte, 32 for 1-byte.
    return max(8, 32 // max(1, itemsize))


def _choose_2d_tiling(total_elems: int, itemsize: int):
    """Pick (rows, row_tile, lane) for a lane-dense 2D copy, or None."""
    sub = _sublane_multiple(itemsize)
    for lane in (1024, 512, 256, 128):
        if total_elems % lane != 0:
            continue
        rows = total_elems // lane
        if rows <= sub:
            # Tiny input: one block whose row dim equals the full array dim
            # (satisfies the "divisible-or-full" rule without padding).
            return rows, rows, lane
        target_rows = max(sub, _TILE_TARGET_BYTES // (lane * itemsize))
        row_tile = (min(target_rows, rows) // sub) * sub
        row_tile = max(row_tile, sub)
        return rows, row_tile, lane
    return None


def _pallas_copy_2d(x2: jax.Array, rows: int, row_tile: int, lane: int,
                    cost: pl.CostEstimate) -> jax.Array:
    grid = (pl.cdiv(rows, row_tile),)          # ragged last block is fine (masked stores)
    spec = pl.BlockSpec((row_tile, lane), lambda i: (i, 0))
    return pl.pallas_call(
        _copy_kernel,
        out_shape=jax.ShapeDtypeStruct((rows, lane), x2.dtype),
        grid=grid,
        in_specs=[spec],
        out_specs=spec,
        input_output_aliases={0: 0},
        compiler_params=pltpu.CompilerParams(
            dimension_semantics=("parallel",),
            vmem_limit_bytes=_VMEM_LIMIT_BYTES,
        ),
        cost_estimate=cost,
    )(x2)


def _pallas_copy_1d(x1: jax.Array, total: int, itemsize: int,
                    cost: pl.CostEstimate) -> jax.Array:
    """Fallback for element counts not divisible by 128: ragged 1-D grid."""
    if total <= 128:
        block = total                                        # one tiny full block
    else:
        block = ((_TILE_TARGET_BYTES // itemsize) // 1024) * 1024
        block = max(1024, min(block, (max(total, 1024) // 1024) * 1024))
    grid = (pl.cdiv(total, block),)
    spec = pl.BlockSpec((block,), lambda i: (i,))
    return pl.pallas_call(
        _copy_kernel,
        out_shape=jax.ShapeDtypeStruct((total,), x1.dtype),
        grid=grid,
        in_specs=[spec],
        out_specs=spec,
        input_output_aliases={0: 0},
        compiler_params=pltpu.CompilerParams(
            dimension_semantics=("parallel",),
            vmem_limit_bytes=_VMEM_LIMIT_BYTES,
        ),
        cost_estimate=cost,
    )(x1)


def resnet_forward(x: jax.Array) -> jax.Array:
    """Forward pass of the (identity) ResNet module.

    The module's forward is `return x`; the optimal implementation launches no
    kernel at all (zero HBM traffic).  Use `resnet_forward_pallas` if an
    explicit Pallas kernel launch is required.
    """
    return x


def resnet_forward_pallas(x: jax.Array) -> jax.Array:
    """Identity forward implemented as a tuned Pallas TPU copy kernel.

    WARNING: x's buffer is donated (input_output_aliases={0: 0}); callers must
    not read x after this call.
    """
    orig_shape = x.shape
    total = x.size
    itemsize = jnp.dtype(x.dtype).itemsize
    cost = pl.CostEstimate(flops=0, transcendentals=0,
                           bytes_accessed=2 * total * itemsize)

    tiling = _choose_2d_tiling(total, itemsize)
    if tiling is None:
        # Element count not a multiple of 128: ragged 1-D tiled copy
        # (never whole-array VMEM residency).
        y1 = _pallas_copy_1d(x.reshape(total), total, itemsize, cost)
        return y1.reshape(orig_shape)

    rows, row_tile, lane = tiling
    x2 = x.reshape(rows, lane)                 # lane-dense 2D slab
    y2 = _pallas_copy_2d(x2, rows, row_tile, lane, cost)
    return y2.reshape(orig_shape)


if __name__ == "__main__":
    # No parameters to initialize: the module's __init__ registers nothing.
    key = jax.random.PRNGKey(0)
    shape, dtype = (2, 4, 16, 16), jnp.float32
    x = jax.random.normal(key, shape, dtype=dtype)
    # Regenerate the reference from the same key so we never touch `x` after
    # the kernel call (its buffer is donated via input_output_aliases).
    expected = jax.random.normal(key, shape, dtype=dtype)

    # Primary path: no kernel launch (review recommendation #1).
    y_noop = resnet_forward(x)
    assert y_noop is x

    # Explicit Pallas kernel path (tuned aliased identity copy).
    y = resnet_forward_pallas(x)
    jax.block_until_ready(y)

    assert y.shape == shape and y.dtype == dtype
    assert bool(jnp.all(y == expected))
    print("KERNEL_OK")
</pallas_src>

<mosaic_0001>
module attributes {stable_mosaic.version = 11 : i64} {
  func.func @_copy_kernel(%arg0: i32, %arg1: memref<2x1024xf32, #tpu.memory_space<vmem>>, %arg2: memref<2x1024xf32, #tpu.memory_space<vmem>>) attributes {dimension_semantics = [#tpu.dimension_semantics<parallel>], iteration_bounds = array<i64: 1>, scalar_prefetch = 0 : i64, scratch_operands = 0 : i64, tpu.core_type = #tpu.core_type<tc>, window_params = [{transform_indices = @transform_0, window_bounds = array<i64: 2, 1024>}, {transform_indices = @transform_1, window_bounds = array<i64: 2, 1024>}]} {
    %c0 = arith.constant 0 : index
    %c0_0 = arith.constant 0 : index
    %0 = vector.load %arg1[%c0, %c0_0] : memref<2x1024xf32, #tpu.memory_space<vmem>>, vector<2x1024xf32>
    %c0_1 = arith.constant 0 : index
    %c0_2 = arith.constant 0 : index
    %1 = vector.load %arg2[%c0_1, %c0_2] : memref<2x1024xf32, #tpu.memory_space<vmem>>, vector<2x1024xf32>
    tpu.vector_store %arg2[%c0_1, %c0_2], %0 {strides = array<i32>} : memref<2x1024xf32, #tpu.memory_space<vmem>>, vector<2x1024xf32>,
    return
  }
  func.func @transform_0(%arg0: i32) -> (i32, i32) {
    %c0_i32 = arith.constant 0 : i32
    %c0_i32_0 = arith.constant 0 : i32
    return %arg0, %c0_i32 : i32, i32
  }
  func.func @transform_1(%arg0: i32) -> (i32, i32) {
    %c0_i32 = arith.constant 0 : i32
    %c0_i32_0 = arith.constant 0 : i32
    return %arg0, %c0_i32 : i32, i32
  }
}

</mosaic_0001>

<bundles_post_ra>
// kernel: tpu_custom_call.1
= control target key start
LH: loop header
LB: loop body
LE: loop exit
PB: predicated region body
PF: predicated region fallthrough
CT: control target
= control target key end

     0   :  { %6 = vsyncpa [#allocation3], 0  ;;  %s126_s0 = inlined_call_operand.hbm [shape: f32[2,1024], index: 0, kind: input, shape index: {}, may-alias: {0,1}]   ;;  %s127_s1 = inlined_call_operand.hbm [shape: f32[2,1024], index: 1, kind: output, shape index: {}, may-alias: {0,1}]  }
   0x1   :  { %7 = vsyncpa [#allocation4], 0  ;;  %s90_s6 = smov [#allocation2]   ;;  %s42_s10 = scalar_lea.hbm %s126_s0, 256 }
   0x2   :  { %s14_s7 = sshll.u32 %s90_s6, 4  ;;  %p43_p0 = scmp.ne.s32.totalorder %s126_s0, %s42_s10  ;;  %s15_s7 = int_to_ptr.vmem [resolvable:$true] %s14_s7 }
   0x3   :  { %p46_p1 = scmp.lt.u32.totalorder %s42_s10, %s126_s0 }
   0x5   :  { %p48_p2 = pnand %p46_p1, %p43_p0 }
   0x7   :  { %51 = shalt.err (!%p48_p2)
}
   0x8   :  { %s52_s15 = scalar_lea.vmem %s15_s7, 256  ;;  %p57_p4 = scmp.lt.s32.totalorder %s15_s7, %s15_s7 }
   0x9   :  { %p53_p3 = scmp.ne.s32.totalorder %s15_s7, %s52_s15  ;;  %p58_p5 = scmp.lt.s32.totalorder %s52_s15, %s52_s15 }
   0xb   :  { %p59_p6 = por %p58_p5, %p57_p4 }
   0xd   :  { %p60_p7 = pnand %p59_p6, %p53_p3 }
   0xf   :  { %63 = shalt.err (!%p60_p7)
}
  0x10   :  { %17 = dma.hbm_to_vmem [thread:$0]  %s126_s0, 256, %s15_s7, [#allocation3]  }
  0x11   :  { %86 = dma.done.wait [#allocation3], 256  }
  0x12   :  { %87 = vsyncadd [#allocation3], 4294967040  ;;  %s91_s18 = smov [#allocation5]   ;;  %v21_v0 = vld [vmem:[#allocation2] sm:$0xff]  ;;  %v22_v1 = vld [vmem:[#allocation2 + $0x8] sm:$0xff] }
  0x13   :  { %s31_s19 = sshll.u32 %s91_s18, 4  ;;  %23 = vst [vmem:[#allocation5] sm:$0xff] %v21_v0  ;;  %24 = vst [vmem:[#allocation5 + $0x8] sm:$0xff] %v22_v1  ;;  %s32_s19 = int_to_ptr.vmem [resolvable:$true] %s31_s19 }
  0x14   :  { %s64_s20 = scalar_lea.vmem %s32_s19, 256  ;;  %p69_p9 = scmp.lt.s32.totalorder %s32_s19, %s32_s19 }
  0x15   :  { %p65_p8 = scmp.ne.s32.totalorder %s32_s19, %s64_s20  ;;  %p70_p10 = scmp.lt.s32.totalorder %s64_s20, %s64_s20 }
  0x17   :  { %p71_p11 = por %p70_p10, %p69_p9 }
  0x19   :  { %p72_p12 = pnand %p71_p11, %p65_p8 }
  0x1b   :  { %75 = shalt.err (!%p72_p12)
}
  0x1c   :  { %s76_s0 = scalar_lea.hbm %s127_s1, 256 }
  0x1d   :  { %p77_p13 = scmp.ne.s32.totalorder %s127_s1, %s76_s0  ;;  %p80_p0 = scmp.lt.u32.totalorder %s76_s0, %s127_s1 }
  0x1f   :  { %p82_p1 = pnand %p80_p0, %p77_p13 }
  0x21   :  { %85 = shalt.err (!%p82_p1)
}
  0x22   :  { %34 = dma.vmem_to_hbm [thread:$0]  %s32_s19, 256, %s127_s1, [#allocation4]  }
  0x23   :  { %88 = dma.done.wait [#allocation4], 256  }
  0x24   :  { %89 = vsyncadd [#allocation4], 4294967040 }
  0x25   :  { %38 = vsyncpa [#allocation3], 1 }
  0x26   :  { %39 = vsyncpa [#allocation4], 1 }

</bundles_post_ra>
